<compile_context>
chip_gen: v5e
topology: v5e:2x2
jax: 0.10.0
libtpu: 0.0.40
codegen_flags: <defaults>
</compile_context>

<pallas_src>
import functools
import math

import jax
import jax.numpy as jnp
from jax import lax
from jax.experimental import pallas as pl
from jax.experimental.pallas import tpu as pltpu


_INV_MP_SILU = 1.0 / 0.596                 # MPSiLU's /0.596 folded into a multiply
_VMEM_LIMIT_BYTES = 48 * 1024 * 1024       # > 32 MiB scoped default, < v7x 64 MiB phys
_TARGET_TILE_BYTES = 4 * 1024 * 1024       # per-block HBM slab target


# ----------------------------------------------------------------------------
# Layout / tiling helpers
# ----------------------------------------------------------------------------

def _compiler_params():
    return pltpu.CompilerParams(
        dimension_semantics=("parallel", "parallel"),
        vmem_limit_bytes=_VMEM_LIMIT_BYTES)


def _cost(bytes_accessed, flops=0, transcendentals=0):
    return pl.CostEstimate(flops=int(flops),
                           transcendentals=int(transcendentals),
                           bytes_accessed=int(bytes_accessed))


def _choose_c_lane(C, HW):
    """Put channels on the lane (last) axis only when that is the lane-dense
    choice: C is a 128-multiple while HW is not (deep stages, small spatial)."""
    if HW % 128 == 0:
        return False
    return C % 128 == 0


def _pick_tile(HW, C, itemsize, align, n_batch, target_bytes=_TARGET_TILE_BYTES):
    """Tile length along the tiled spatial axis: a multiple of `align` sized so
    each block is ~<= target_bytes, or the full HW when it cannot be split."""
    if HW % align != 0:
        return HW
    t = (target_bytes // max(1, C * itemsize)) // align * align
    t = int(max(align, min(t, HW)))
    if n_batch < 2 and HW >= 2 * align:
        # v7x has 2 TensorCores; keep the parallel grid >= 2 so neither idles.
        half = ((HW // 2 + align - 1) // align) * align
        t = min(t, max(align, half))
    return HW if t >= HW else t


def _grid_and_spec(N, C, HW, itemsize, c_lane, tile_hw=None):
    align = 8 if c_lane else 128
    thw = tile_hw if tile_hw is not None else _pick_tile(HW, C, itemsize, align, N)
    grid = (N, pl.cdiv(HW, thw))
    if c_lane:
        spec = pl.BlockSpec((pl.Squeezed(), thw, C), lambda n, s: (n, s, 0))
    else:
        spec = pl.BlockSpec((pl.Squeezed(), C, thw), lambda n, s: (n, 0, s))
    return grid, spec, thw


def _to_layout(x4, c_lane):
    """(N,C,H,W) -> (N,C,HW) [hw_lane] or (N,HW,C) [c_lane]."""
    N, C = x4.shape[0], x4.shape[1]
    HW = math.prod(x4.shape[2:])
    x3 = x4.reshape(N, C, HW)
    if c_lane:
        x3 = jnp.swapaxes(x3, 1, 2)
    return x3


def _from_layout(x3, shape4, c_lane):
    if c_lane:
        x3 = jnp.swapaxes(x3, 1, 2)
    return x3.reshape(shape4)


# ----------------------------------------------------------------------------
# Kernel bodies
# ----------------------------------------------------------------------------

def _silu_mp(x):
    # silu(x)/0.596 with sigmoid(x) = 0.5*(1 + tanh(x/2)): tanh goes to the EUP,
    # no f32 divide, no inf*0 edge case.
    return x * (0.5 + 0.5 * jnp.tanh(0.5 * x)) * _INV_MP_SILU


def _pn_silu_kernel(x_ref, xn_ref, h_ref, *, eps, scale, caxis):
    x = x_ref[...].astype(jnp.float32)
    norm = jnp.sqrt(jnp.sum(x * x, axis=caxis, keepdims=True))
    inv = scale / (norm + eps)              # per-column factor; folded sqrt(C)
    xn = x * inv
    xn_ref[...] = xn.astype(xn_ref.dtype)
    h_ref[...] = _silu_mp(xn).astype(h_ref.dtype)


def _conv1_pn_silu_kernel(w_ref, x_ref, xn_ref, h_ref, *, eps, scale, caxis, c_lane):
    x = x_ref[...].astype(jnp.float32)
    w = w_ref[...].astype(jnp.float32)
    if c_lane:
        y = jnp.dot(x, w, preferred_element_type=jnp.float32)   # (THW,Cin)@(Cin,Cout)
    else:
        y = jnp.dot(w, x, preferred_element_type=jnp.float32)   # (Cout,Cin)@(Cin,THW)
    norm = jnp.sqrt(jnp.sum(y * y, axis=caxis, keepdims=True))
    inv = scale / (norm + eps)
    xn = y * inv
    xn_ref[...] = xn.astype(xn_ref.dtype)
    h_ref[...] = _silu_mp(xn).astype(h_ref.dtype)


def _mod_silu_kernel(h_ref, e_ref, o_ref):
    h = h_ref[...].astype(jnp.float32)      # (C,THW) or (THW,C)
    e = e_ref[...].astype(jnp.float32)      # (C,1)   or (1,C) -> broadcasts
    y = h * (1.0 + e)
    o_ref[...] = _silu_mp(y).astype(o_ref.dtype)


def _mp_sum_kernel(x_ref, y_ref, o_ref, *, a, b):
    x = x_ref[...].astype(jnp.float32)
    y = y_ref[...].astype(jnp.float32)
    o_ref[...] = (a * x + b * y).astype(o_ref.dtype)


# ----------------------------------------------------------------------------
# Pallas wrappers
# ----------------------------------------------------------------------------

def pixel_norm_mp_silu(x, eps=1e-4, *, tile_hw=None):
    """x: (N,C,H,W). Returns (pixel_norm(x), mp_silu(pixel_norm(x)))."""
    shape4 = x.shape
    N, C = shape4[0], shape4[1]
    HW = math.prod(shape4[2:])
    itemsize = jnp.dtype(x.dtype).itemsize
    c_lane = _choose_c_lane(C, HW)
    grid, spec, _ = _grid_and_spec(N, C, HW, itemsize, c_lane, tile_hw)
    x3 = _to_layout(x, c_lane)
    size = x3.size
    xn3, h3 = pl.pallas_call(
        functools.partial(_pn_silu_kernel, eps=float(eps), scale=math.sqrt(C),
                          caxis=(-1 if c_lane else 0)),
        out_shape=(jax.ShapeDtypeStruct(x3.shape, x.dtype),
                   jax.ShapeDtypeStruct(x3.shape, x.dtype)),
        grid_spec=pltpu.PrefetchScalarGridSpec(
            num_scalar_prefetch=0, grid=grid,
            in_specs=[spec], out_specs=(spec, spec)),
        compiler_params=_compiler_params(),
        cost_estimate=_cost(3 * size * itemsize, flops=6 * size,
                            transcendentals=size),
    )(x3)
    return _from_layout(xn3, shape4, c_lane), _from_layout(h3, shape4, c_lane)


def conv1_pixel_norm_mp_silu(x, w, eps=1e-4, *, tile_hw=None):
    """Fused 1x1 mp-Conv2d -> PixelNorm -> MPSiLU.

    x: (N,Cin,H,W); w: (Cout,Cin,1,1). Returns (x_norm, mp_silu(x_norm)),
    both (N,Cout,H,W). The 1x1 conv runs on the otherwise-idle MXU.
    """
    N, Cin = x.shape[0], x.shape[1]
    spatial = x.shape[2:]
    HW = math.prod(spatial)
    Cout = w.shape[0]
    itemsize = jnp.dtype(x.dtype).itemsize
    c_lane = _choose_c_lane(Cout, HW)
    align = 8 if c_lane else 128
    thw = tile_hw if tile_hw is not None else _pick_tile(
        HW, max(Cin, Cout), itemsize, align, N)
    grid = (N, pl.cdiv(HW, thw))

    fan_in = math.prod(w.shape[1:])
    wn = (_normalize_weight(w, eps) / math.sqrt(fan_in)).reshape(Cout, Cin)
    wn = wn.astype(jnp.float32)

    if c_lane:
        wn = wn.T                                                     # (Cin,Cout)
        w_spec = pl.BlockSpec((Cin, Cout), lambda n, s: (0, 0))
        in_spec = pl.BlockSpec((pl.Squeezed(), thw, Cin), lambda n, s: (n, s, 0))
        out_spec = pl.BlockSpec((pl.Squeezed(), thw, Cout), lambda n, s: (n, s, 0))
        out_shape3 = (N, HW, Cout)
    else:
        w_spec = pl.BlockSpec((Cout, Cin), lambda n, s: (0, 0))
        in_spec = pl.BlockSpec((pl.Squeezed(), Cin, thw), lambda n, s: (n, 0, s))
        out_spec = pl.BlockSpec((pl.Squeezed(), Cout, thw), lambda n, s: (n, 0, s))
        out_shape3 = (N, Cout, HW)

    x3 = _to_layout(x, c_lane)
    out4 = (N, Cout) + tuple(spatial)
    size_out = N * Cout * HW
    xn3, h3 = pl.pallas_call(
        functools.partial(_conv1_pn_silu_kernel, eps=float(eps),
                          scale=math.sqrt(Cout),
                          caxis=(-1 if c_lane else 0), c_lane=c_lane),
        out_shape=(jax.ShapeDtypeStruct(out_shape3, x.dtype),
                   jax.ShapeDtypeStruct(out_shape3, x.dtype)),
        grid_spec=pltpu.PrefetchScalarGridSpec(
            num_scalar_prefetch=0, grid=grid,
            in_specs=[w_spec, in_spec], out_specs=(out_spec, out_spec)),
        compiler_params=_compiler_params(),
        cost_estimate=_cost((x3.size + 2 * size_out) * itemsize + wn.size * 4,
                            flops=2 * N * HW * Cin * Cout + 6 * size_out,
                            transcendentals=size_out),
    )(wn, x3)
    return _from_layout(xn3, out4, c_lane), _from_layout(h3, out4, c_lane)


def modulate_mp_silu(h, e, *, tile_hw=None):
    """h: (N,C,H,W); e: (N,C) kept in f32. Computes MPSiLU(h * (1 + e[...,None,None]))."""
    shape4 = h.shape
    N, C = shape4[0], shape4[1]
    HW = math.prod(shape4[2:])
    itemsize = jnp.dtype(h.dtype).itemsize
    c_lane = _choose_c_lane(C, HW)
    grid, spec, _ = _grid_and_spec(N, C, HW, itemsize, c_lane, tile_hw)
    if c_lane:
        e_spec = pl.BlockSpec((pl.Squeezed(), 1, C), lambda n, s: (n, 0, 0))
        e3 = e.reshape(N, 1, C).astype(jnp.float32)
    else:
        e_spec = pl.BlockSpec((pl.Squeezed(), C, 1), lambda n, s: (n, 0, 0))
        e3 = e.reshape(N, C, 1).astype(jnp.float32)
    h3 = _to_layout(h, c_lane)
    size = h3.size
    out3 = pl.pallas_call(
        _mod_silu_kernel,
        out_shape=jax.ShapeDtypeStruct(h3.shape, h.dtype),
        grid_spec=pltpu.PrefetchScalarGridSpec(
            num_scalar_prefetch=0, grid=grid,
            in_specs=[spec, e_spec], out_specs=spec),
        compiler_params=_compiler_params(),
        cost_estimate=_cost(2 * size * itemsize + e3.size * 4,
                            flops=4 * size, transcendentals=size),
    )(h3, e3)
    return _from_layout(out3, shape4, c_lane)


def mp_sum(x, y, t=0.3, *, tile_hw=None):
    """((1-t)*x + t*y) / sqrt((1-t)^2 + t^2), constants folded into two multiplies."""
    shape4 = x.shape
    N, C = shape4[0], shape4[1]
    HW = math.prod(shape4[2:])
    itemsize = jnp.dtype(x.dtype).itemsize
    c_lane = _choose_c_lane(C, HW)
    grid, spec, _ = _grid_and_spec(N, C, HW, itemsize, c_lane, tile_hw)
    x3 = _to_layout(x, c_lane)
    y3 = _to_layout(y, c_lane)
    denom = math.sqrt((1.0 - t) ** 2 + t ** 2)
    a = (1.0 - t) / denom
    b = t / denom
    size = x3.size
    out3 = pl.pallas_call(
        functools.partial(_mp_sum_kernel, a=float(a), b=float(b)),
        out_shape=jax.ShapeDtypeStruct(x3.shape, x.dtype),
        grid_spec=pltpu.PrefetchScalarGridSpec(
            num_scalar_prefetch=0, grid=grid,
            in_specs=[spec, spec], out_specs=spec),
        compiler_params=_compiler_params(),
        cost_estimate=_cost(3 * size * itemsize, flops=3 * size),
    )(x3, y3)
    return _from_layout(out3, shape4, c_lane)


# ----------------------------------------------------------------------------
# Magnitude-preserving Conv2d / Linear weight prep (JAX glue)
# ----------------------------------------------------------------------------

def _normalize_weight(w, eps=1e-4):
    # PyTorch normalize(): w / (eps + ||w||_{dims>=1} / sqrt(fan_in))
    axes = tuple(range(1, w.ndim))
    n = jnp.sqrt(jnp.sum(jnp.square(w.astype(jnp.float32)), axis=axes,
                         keepdims=True))
    alpha = 1.0 / math.sqrt(math.prod(w.shape[1:]))
    return (w / (eps + alpha * n)).astype(w.dtype)


def mp_conv2d(x, w, *, padding, eps=1e-4):
    # TODO(synk): 3x3 convolution itself is left to XLA (lax.conv_general_dilated);
    # no hand-written im2col/MXU Pallas conv at this scope.
    fan_in = math.prod(w.shape[1:])
    wn = _normalize_weight(w, eps) / math.sqrt(fan_in)
    return lax.conv_general_dilated(
        x, wn.astype(x.dtype), window_strides=(1, 1),
        padding=[(padding, padding), (padding, padding)],
        dimension_numbers=("NCHW", "OIHW", "NCHW"))


def mp_linear(e, w, *, eps=1e-4):
    fan_in = w.shape[1]
    wn = _normalize_weight(w, eps) / math.sqrt(fan_in)
    return e.astype(jnp.float32) @ wn.astype(jnp.float32).T


# ----------------------------------------------------------------------------
# Encoder forward (eval mode), Pallas path and pure-JAX reference
# ----------------------------------------------------------------------------

def init_encoder_params(key, in_channels, out_channels, hidden_dim):
    ks = jax.random.split(key, 4)
    params = {
        "conv2_w": jax.random.normal(ks[1], (out_channels, out_channels, 3, 3),
                                     jnp.float32),
        "conv3_w": jax.random.normal(ks[2], (out_channels, out_channels, 3, 3),
                                     jnp.float32),
        "linear_w": jax.random.normal(ks[3], (out_channels, hidden_dim),
                                      jnp.float32),
        # Module init is zeros(1); a nonzero value exercises the modulation path.
        "gain": jnp.full((1,), 0.1, jnp.float32),
    }
    if in_channels != out_channels:
        params["conv1_w"] = jax.random.normal(
            ks[0], (out_channels, in_channels, 1, 1), jnp.float32)
    return params


def encoder_forward(params, x, emb, *, downsample=True, t=0.3, eps=1e-4):
    if downsample:
        x = x[:, :, ::2, ::2]                      # nearest, scale_factor=2
    if "conv1_w" in params:
        # Fused: 1x1 mp-conv (MXU) + PixelNorm + MPSiLU in one HBM pass.
        x, h = conv1_pixel_norm_mp_silu(x, params["conv1_w"], eps=eps)
    else:
        x, h = pixel_norm_mp_silu(x, eps=eps)      # fused PixelNorm + MPSiLU
    h = mp_conv2d(h, params["conv2_w"], padding=1, eps=eps)
    e = params["gain"] * mp_linear(emb, params["linear_w"], eps=eps)   # (N, C), f32
    h = modulate_mp_silu(h, e)                     # Pallas: h*(1+e), then MPSiLU
    # TODO(synk): Dropout implemented in eval mode (identity); training-mode
    # masking / in-place weight re-normalization / activation_array logging omitted.
    h = mp_conv2d(h, params["conv3_w"], padding=1, eps=eps)
    x = mp_sum(x, h, t=t)                          # Pallas
    # TODO(synk): attention=True branch (SelfAttention) not implemented; it is
    # mutually exclusive with downsample and needs channels % 64 == 0.
    return x


def pixel_norm_ref(x, eps=1e-4):
    C = x.shape[1]
    norm = jnp.sqrt(jnp.sum(jnp.square(x.astype(jnp.float32)), axis=1,
                            keepdims=True))
    return (math.sqrt(C) * x / (norm + eps)).astype(x.dtype)


def mp_silu_ref(x):
    return jax.nn.silu(x) / 0.596


def encoder_forward_ref(params, x, emb, *, downsample=True, t=0.3, eps=1e-4):
    if downsample:
        x = x[:, :, ::2, ::2]
    if "conv1_w" in params:
        x = mp_conv2d(x, params["conv1_w"], padding=0, eps=eps)
    x = pixel_norm_ref(x, eps=eps)
    h = mp_silu_ref(x)
    h = mp_conv2d(h, params["conv2_w"], padding=1, eps=eps)
    e = params["gain"] * mp_linear(emb, params["linear_w"], eps=eps)
    h = h * (1.0 + e[:, :, None, None])
    h = mp_silu_ref(h)
    h = mp_conv2d(h, params["conv3_w"], padding=1, eps=eps)
    return ((1.0 - t) * x + t * h) / math.sqrt((1.0 - t) ** 2 + t ** 2)


if __name__ == "__main__":
    key = jax.random.PRNGKey(0)
    k_x, k_e, k_p, k_t, k_c = jax.random.split(key, 5)

    N, Cin, Cout, H, W, hidden = 2, 4, 8, 16, 16, 32
    x = jax.random.normal(k_x, (N, Cin, H, W), dtype=jnp.float32)
    emb = jax.random.normal(k_e, (N, hidden), dtype=jnp.float32)
    params = init_encoder_params(k_p, Cin, Cout, hidden)

    # 1) Fused PixelNorm+MPSiLU, forcing the multi-tile (+ partial last tile),
    #    HW-on-lane path.
    xt = jax.random.normal(k_t, (1, 8, 20, 16), dtype=jnp.float32)   # HW = 320
    xn, h = pixel_norm_mp_silu(xt, tile_hw=128)
    jax.block_until_ready((xn, h))
    assert xn.shape == xt.shape and h.shape == xt.shape
    assert jnp.allclose(xn, pixel_norm_ref(xt), atol=1e-5, rtol=1e-5)
    assert jnp.allclose(h, mp_silu_ref(pixel_norm_ref(xt)), atol=1e-5, rtol=1e-5)

    # 2) Channels-on-lane layout path (C % 128 == 0, HW % 128 != 0).
    xc = jax.random.normal(k_c, (1, 128, 8, 8), dtype=jnp.float32)
    xn2, h2 = pixel_norm_mp_silu(xc)
    jax.block_until_ready((xn2, h2))
    assert jnp.allclose(xn2, pixel_norm_ref(xc), atol=1e-5, rtol=1e-5)
    assert jnp.allclose(h2, mp_silu_ref(pixel_norm_ref(xc)), atol=1e-5, rtol=1e-5)

    # 3) Full Encoder forward (downsample=True, attention=False, eval mode).
    out = jax.block_until_ready(encoder_forward(params, x, emb))
    ref = encoder_forward_ref(params, x, emb)
    assert out.shape == (N, Cout, H // 2, W // 2)
    assert jnp.allclose(out, ref, atol=1e-4, rtol=1e-4)

    print("KERNEL_OK")
</pallas_src>

<mosaic_0001>
module attributes {stable_mosaic.version = 11 : i64} {
  func.func @_pn_silu_kernel(%arg0: i32, %arg1: i32, %arg2: memref<1x8x128xf32, #tpu.memory_space<vmem>>, %arg3: memref<1x8x128xf32, #tpu.memory_space<vmem>>, %arg4: memref<1x8x128xf32, #tpu.memory_space<vmem>>) attributes {dimension_semantics = [#tpu.dimension_semantics<parallel>, #tpu.dimension_semantics<parallel>], iteration_bounds = array<i64: 1, 3>, scalar_prefetch = 0 : i64, scratch_operands = 0 : i64, tpu.core_type = #tpu.core_type<tc>, window_params = [{transform_indices = @transform_0, window_bounds = array<i64: 1, 8, 128>}, {transform_indices = @transform_1, window_bounds = array<i64: 1, 8, 128>}, {transform_indices = @transform_2, window_bounds = array<i64: 1, 8, 128>}]} {
    %c0 = arith.constant 0 : index
    %c0_0 = arith.constant 0 : index
    %c0_1 = arith.constant 0 : index
    %0 = vector.load %arg2[%c0, %c0_0, %c0_1] : memref<1x8x128xf32, #tpu.memory_space<vmem>>, vector<1x8x128xf32>
    %1 = vector.shape_cast %0 : vector<1x8x128xf32> to vector<8x128xf32>
    %2 = arith.mulf %1, %1 : vector<8x128xf32>
    %cst = arith.constant dense<0.000000e+00> : vector<128xf32>
    %3 = vector.multi_reduction <add>, %2, %cst [0] : vector<8x128xf32> to vector<128xf32>
    %4 = vector.shape_cast %3 : vector<128xf32> to vector<1x128xf32>
    %5 = math.sqrt %4 : vector<1x128xf32>
    %cst_2 = arith.constant 9.99999974E-5 : f32
    %6 = vector.broadcast %cst_2 : f32 to vector<1x128xf32>
    %7 = arith.addf %5, %6 : vector<1x128xf32>
    %cst_3 = arith.constant 2.82842708 : f32
    %8 = vector.broadcast %cst_3 : f32 to vector<1x128xf32>
    %9 = arith.divf %8, %7 : vector<1x128xf32>
    %10 = vector.broadcast %9 : vector<1x128xf32> to vector<8x128xf32>
    %11 = arith.mulf %1, %10 : vector<8x128xf32>
    %c0_4 = arith.constant 0 : index
    %c0_5 = arith.constant 0 : index
    %c0_6 = arith.constant 0 : index
    %12 = vector.load %arg3[%c0_4, %c0_5, %c0_6] : memref<1x8x128xf32, #tpu.memory_space<vmem>>, vector<1x8x128xf32>
    %13 = vector.shape_cast %12 : vector<1x8x128xf32> to vector<8x128xf32>
    %14 = vector.shape_cast %11 : vector<8x128xf32> to vector<1x8x128xf32>
    tpu.vector_store %arg3[%c0_4, %c0_5, %c0_6], %14 {strides = array<i32>} : memref<1x8x128xf32, #tpu.memory_space<vmem>>, vector<1x8x128xf32>,
    %cst_7 = arith.constant 5.000000e-01 : f32
    %15 = vector.broadcast %cst_7 : f32 to vector<8x128xf32>
    %16 = arith.mulf %15, %11 : vector<8x128xf32>
    %17 = math.tanh %16 : vector<8x128xf32>
    %cst_8 = arith.constant 5.000000e-01 : f32
    %18 = vector.broadcast %cst_8 : f32 to vector<8x128xf32>
    %19 = arith.mulf %18, %17 : vector<8x128xf32>
    %cst_9 = arith.constant 5.000000e-01 : f32
    %20 = vector.broadcast %cst_9 : f32 to vector<8x128xf32>
    %21 = arith.addf %20, %19 : vector<8x128xf32>
    %22 = arith.mulf %11, %21 : vector<8x128xf32>
    %cst_10 = arith.constant 1.67785239 : f32
    %23 = vector.broadcast %cst_10 : f32 to vector<8x128xf32>
    %24 = arith.mulf %22, %23 : vector<8x128xf32>
    %c0_11 = arith.constant 0 : index
    %c0_12 = arith.constant 0 : index
    %c0_13 = arith.constant 0 : index
    %25 = vector.load %arg4[%c0_11, %c0_12, %c0_13] : memref<1x8x128xf32, #tpu.memory_space<vmem>>, vector<1x8x128xf32>
    %26 = vector.shape_cast %25 : vector<1x8x128xf32> to vector<8x128xf32>
    %27 = vector.shape_cast %24 : vector<8x128xf32> to vector<1x8x128xf32>
    tpu.vector_store %arg4[%c0_11, %c0_12, %c0_13], %27 {strides = array<i32>} : memref<1x8x128xf32, #tpu.memory_space<vmem>>, vector<1x8x128xf32>,
    return
  }
  func.func @transform_0(%arg0: i32, %arg1: i32) -> (i32, i32, i32) {
    %c0_i32 = arith.constant 0 : i32
    %c0_i32_0 = arith.constant 0 : i32
    return %arg0, %c0_i32, %arg1 : i32, i32, i32
  }
  func.func @transform_1(%arg0: i32, %arg1: i32) -> (i32, i32, i32) {
    %c0_i32 = arith.constant 0 : i32
    %c0_i32_0 = arith.constant 0 : i32
    return %arg0, %c0_i32, %arg1 : i32, i32, i32
  }
  func.func @transform_2(%arg0: i32, %arg1: i32) -> (i32, i32, i32) {
    %c0_i32 = arith.constant 0 : i32
    %c0_i32_0 = arith.constant 0 : i32
    return %arg0, %c0_i32, %arg1 : i32, i32, i32
  }
}

</mosaic_0001>

<bundles_post_ra>
// kernel: tpu_custom_call.1
= control target key start
LH: loop header
LB: loop body
LE: loop exit
PB: predicated region body
PF: predicated region fallthrough
CT: control target
= control target key end

     0   :  { %8 = vsyncpa [#allocation3], 0  ;;  %s784_s0 = inlined_call_operand.hbm [shape: f32[1,8,320], index: 0, kind: input, shape index: {}]   ;;  %s785_s1 = inlined_call_operand.hbm [shape: f32[1,8,320], index: 1, kind: output, shape index: {0}]   ;;  %s786_s2 = inlined_call_operand.hbm [shape: f32[1,8,320], index: 2, kind: output, shape index: {1}]  }
   0x1   :  { %10 = vsyncpa [#allocation3 + $0x1], 0 }
   0x2   :  { %11 = vsyncpa [#allocation4], 0 }
   0x3   :  { %13 = vsyncpa [#allocation4 + $0x1], 0 }
   0x4   :  { %14 = vsyncpa [#allocation7], 0 }
   0x5   :  { %16 = vsyncpa [#allocation7 + $0x1], 0  ;;  %s643_s9 = smov 0   ;;  %s645_s10 = smov 0  }
   0x6   :  { %s647_s11 = smov 0   ;;  %s649_s12 = smov 0  }
   0x7   :  { %s651_s13 = smov 0   ;;  %s653_s14 = smov 0  }
   0x8 LB: > { %s393_s15 = sadd.s32 4294967295, %s626_s14   ;;  %s394_s16 = sadd.s32 4294967294, %s626_s14   ;;  %s626_s14 = sphi %s653_s14, %s22_s14   ;;  %s622_s13 = sphi %s651_s13, %s795_s13   ;;  %s618_s12 = sphi %s649_s12, %s794_s12   ;;  %s614_s11 = sphi %s647_s11, %s793_s11   ;;  %s610_s10 = sphi %s645_s10, %s792_s10   ;;  %s606_s9 = sphi %s643_s9, %s791_s9  }
   0x9   : > { %s31_s17 = sadd.s32 1, %s622_s13  ;;  %s43_s18 = sadd.s32 1, %s614_s11 }
   0xa   : > { %p32_p0 = scmp.ge.s32.totalorder %s31_s17, 3  ;;  %p50_p1 = scmp.ne.s32.totalorder %s614_s11, %s610_s10 }
   0xb   : > { %p51_p2 = scmp.eq.s32.totalorder %s626_s14, 0  ;;  %p56_p3 = scmp.ne.s32.totalorder %s610_s10, %s606_s9 }
   0xc   : > { %s797_s17 = smov (%p32_p0, %s31_s17), 0  ;;  %p57_p5 = scmp.eq.s32.totalorder %s393_s15, 0 }
   0xd   : > { %p684_p4 = por %p51_p2, %p50_p1  ;;  %s39_s20 = ssub.s32 %s622_s13, %s797_s17 }
   0xe   : > { %p82_p6 = scmp.eq.s32.totalorder %s393_s15, 2  ;;  %p41_p7 = scmp.eq.s32.totalorder %s39_s20, 0 }
   0xf   : > { %p690_p8 = por %p57_p5, %p56_p3  ;;  %p88_p10 = scmp.eq.s32.totalorder %s394_s16, 2 }
  0x10   : > { %p694_p9 = por %p82_p6, %p50_p1  ;;  %p426_p12 = scmp.lt.s32.totalorder %s626_s14, 3 }
  0x11   : > { %s699_s23 = scalar_select %p41_p7, %s614_s11, %s43_s18  }
  0x12   : > { %p701_p11 = por %p88_p10, %p56_p3  ;;  %s136_s25 = sand.u32 1, %s614_s11  }
  0x13   : > { %s397_s26 = sshll.u32 %s136_s25, 3  ;;  %s398_s27 = sshll.u32 %s622_s13, 3 }
  0x14   : > { %s146_s30 = scalar_lea.hbm %s784_s0, %s398_s27  ;;  %s140_s3 = scalar_lea.vmem [#allocation2], %s397_s26 }
  0x15   : > { %s150_s4 = sshll.u32 %s140_s3, 4  ;;  %s148_s5 = sshll.u32 %s146_s30, 4  ;;  %s151_s4 = int_to_ptr.vmem [resolvable:$true] %s150_s4  ;;  %s149_s5 = int_to_ptr.hbm [resolvable:$true] %s148_s5 }
  0x16   : > { %p416_p13 = pnand %p426_p12, %p684_p4  ;;  %p399_p0 = scmp.ge.s32.totalorder %s626_s14, 1 }
  0x17   : > { %p155_p1 = scmp.lt.s32.totalorder %s626_s14, 4  ;;  %s137_s6 = scalar_lea.sflag [#allocation3], %s136_s25 }
  0x18   : > { %418 = dma.hbm_to_vmem [thread:$0]  (!%p416_p13), %s149_s5, 128, %s151_s4, %s137_s6  }
  0x19   : > { %p156_p2 = pnand %p399_p0, %p155_p1 }
  0x1a   : > { %s716_s7 = sand.u32 (!%p156_p2), 1, %s610_s10  }
  0x1b   : > { %159 = sbr.rel (%p156_p2) target bundleno = 112 (0x70), region = 24  ;;  %s719_s8 = sshll.u32 (!%p156_p2), %s716_s7, 3 }
  0x1c   : > { %s162_s15 = scalar_lea.sflag (!%p156_p2), [#allocation3], %s716_s7  ;;  %s165_s16 = scalar_lea.vmem (!%p156_p2), [#allocation2], %s719_s8 }
  0x20   : > { %593 = dma.done.wait (%p690_p8), %s162_s15, 128  }
  0x21   : > { %595 = vsyncadd (%p690_p8), %s162_s15, 4294967168  ;;  %v192_v0 = vld [vmem:[%s165_s16] sm:$0xff]  ;;  %s405_s18 = sshll.u32 %s618_s12, 3  ;;  %s184_s25 = scalar_lea.vmem [#allocation5], %s719_s8 }
  0x22   : > { %v193_v1 = vmul.f32 %v192_v0, %v192_v0  ;;  %s255_s21 = scalar_lea.hbm %s785_s1, %s405_s18  ;;  %s257_s26 = sshll.u32 %s184_s25, 4  ;;  %s258_s26 = int_to_ptr.vmem [resolvable:$true] %s257_s26 }
  0x23   : > { %s259_s27 = sshll.u32 %s255_s21, 4  ;;  %s238_s28 = scalar_lea.sflag [#allocation4], %s716_s7  ;;  %s260_s27 = int_to_ptr.hbm [resolvable:$true] %s259_s27 }
  0x24   : > { %v194_v2 = vrot.slane %v193_v1, 4  ;;  %s526_s29 = sshra.s32 %s260_s27, 4  ;;  %s532_s5 = scalar_lea.hbm %s785_s1, 24  ;;  %s527_s29 = int_to_ptr.hbm [resolvable:$true] %s526_s29 }
  0x25   : > { %s528_s30 = scalar_lea.hbm %s527_s29, 8  ;;  %p533_p6 = scmp.lt.s32.totalorder %s527_s29, %s785_s1 }
  0x26   : > { %v195_v3 = vadd.f32 %v194_v2, %v193_v1  ;;  %p529_p3 = scmp.ne.s32.totalorder %s527_s29, %s528_s30  ;;  %p534_p7 = scmp.lt.s32.totalorder %s532_s5, %s528_s30 }
  0x28   : > { %v196_v4 = vrot.slane %v195_v3, 2  ;;  %p530_p4 = pnand %p529_p3, %p694_p9  ;;  %p535_p8 = por %p534_p7, %p533_p6 }
  0x2a   : > { %v197_v5 = vadd.f32 %v196_v4, %v195_v3  ;;  %p531_p5 = pneg %p530_p4 }
  0x2c   : > { %v198_v6 = vrot.slane %v197_v5, 1  ;;  %p536_p10 = pnand %p535_p8, %p531_p5 }
  0x2e   : > { %v199_v7 = vadd.f32 %v198_v6, %v197_v5 }
  0x30   : > { %476 = vrsqrt.f32 %v199_v7  ;;  %vm207_vm0 = vcmp.eq.f32.partialorder %v199_v7, inf  ;;  %v210_v14 = vand.u32 2147483648, %v199_v7  ;;  %vm209_vm1 = vcmp.eq.f32.partialorder %v199_v7, 0.0 }
  0x36   : > { %v477_v8 = vpop.eup %476 }
  0x37   : > { %v201_v9 = vmul.f32 %v477_v8, %v199_v7 }
  0x39   : > { %v202_v10 = vmul.f32 %v477_v8, %v201_v9 }
  0x3b   : > { %v203_v11 = vmul.f32 0.5, %v202_v10 }
  0x3d   : > { %v204_v12 = vsub.f32 1.5, %v203_v11 }
  0x3f   : > { %v205_v13 = vmul.f32 %v477_v8, %v204_v12 }
  0x41   : > { %v206_v15 = vmul.f32 %v205_v13, %v199_v7 }
  0x43   : > { %v208_v16 = vsel %vm207_vm0, %v199_v7, %v206_v15 }
  0x44   : > { %v211_v17 = vsel %vm209_vm1, %v210_v14, %v208_v16 }
  0x45   : > { %v212_v18 = vadd.f32 0.0001, %v211_v17 }
  0x47   : > { %478 = vrcp.f32 %v212_v18  ;;  %v224_v21 = vand.u32 2147483648, %v212_v18  ;;  %vm218_vm2 = vweird.f32 %v212_v18  ;;  %v222_v23 = vand.u32 2147483647, %v212_v18 }
  0x49   : > { %v225_v25 = vor.u32 1.1754944e-38, %v224_v21  ;;  %vm223_vm5 = vcmp.eq.f32.partialorder %v222_v23, 8.507059e+37 }
  0x4d   : > { %v479_v19 = vpop.eup %478 }
  0x4e   : > { %v214_v20 = vmul.f32 %v479_v19, %v212_v18  ;;  %vm219_vm3 = vweird.f32 %v479_v19 }
  0x4f   : > { %vm220_vm4 = vmor %vm218_vm2, %vm219_vm3 }
  0x50   : > { %v215_v22 = vsub.f32 1.0, %v214_v20 }
  0x52   : > { %v216_v24 = vmul.f32 %v479_v19, %v215_v22 }
  0x54   : > { %v217_v26 = vadd.f32 %v479_v19, %v216_v24 }
  0x56   : > { %v221_v27 = vsel %vm220_vm4, %v479_v19, %v217_v26 }
  0x57   : > { %v226_v28 = vsel %vm223_vm5, %v225_v25, %v221_v27 }
  0x58   : > { %v227_v29 = vmul.f32 2.828427, %v226_v28 }
  0x5a   : > { %v228_v30 = vmul.f32 %v227_v29, %v192_v0 }
  0x5c   : > { %229 = vst [vmem:[%s184_s25] sm:$0xff] %v228_v30  ;;  %v230_v31 = vmul.f32 0.5, %v228_v30 }
  0x5d   : > { %539 = shalt.err (!%p536_p10)
}
  0x5e   : > { %411 = dma.vmem_to_hbm [thread:$0]  (%p694_p9), %s258_s26, 128, %s260_s27, %s238_s28   ;;  %480 = vtanh.f32 %v230_v31 }
  0x5f   : > { %s271_s20 = scalar_lea.hbm %s786_s2, %s405_s18  ;;  %s191_s21 = scalar_lea.vmem [#allocation6], %s719_s8 }
  0x60   : > { %s273_s25 = sshll.u32 %s191_s21, 4  ;;  %s275_s29 = sshll.u32 %s271_s20, 4  ;;  %s274_s25 = int_to_ptr.vmem [resolvable:$true] %s273_s25  ;;  %s276_s29 = int_to_ptr.hbm [resolvable:$true] %s275_s29 }
  0x61   : > { %s243_s30 = scalar_lea.sflag [#allocation7], %s716_s7  ;;  %s554_s26 = sshra.s32 %s276_s29, 4  ;;  %s555_s26 = int_to_ptr.hbm [resolvable:$true] %s554_s26 }
  0x62   : > { %s556_s27 = scalar_lea.hbm %s555_s26, 8  ;;  %s560_s18 = scalar_lea.hbm %s786_s2, 24 }
  0x63   : > { %p557_p12 = scmp.ne.s32.totalorder %s555_s26, %s556_s27  ;;  %p561_p1 = scmp.lt.s32.totalorder %s555_s26, %s786_s2 }
  0x64   : > { %v481_v32 = vpop.eup %480  ;;  %p562_p2 = scmp.lt.s32.totalorder %s560_s18, %s556_s27 }
  0x65   : > { %v232_v33 = vmul.f32 0.5, %v481_v32  ;;  %p558_p13 = pnand %p557_p12, %p694_p9 }
  0x66   : > { %p563_p3 = por %p562_p2, %p561_p1 }
  0x67   : > { %v233_v34 = vadd.f32 0.5, %v232_v33  ;;  %p559_p0 = pneg %p558_p13 }
  0x69   : > { %v234_v35 = vmul.f32 %v233_v34, %v228_v30  ;;  %p564_p4 = pnand %p563_p3, %p559_p0 }
  0x6b   : > { %v235_v36 = vmul.f32 1.6778524, %v234_v35 }
  0x6d   : > { %236 = vst [vmem:[%s191_s21] sm:$0xff] %v235_v36 }
  0x6e   : > { %567 = shalt.err (!%p564_p4)
}
  0x6f   : > { %412 = dma.vmem_to_hbm [thread:$0]  (%p694_p9), %s274_s25, 128, %s276_s29, %s243_s30  }
  0x70 PF: > { %p427_p5 = scmp.ge.s32.totalorder %s626_s14, 2  ;;  %s287_s7 = sand.u32 1, %s606_s9  }
  0x71   : > { %s288_s4 = scalar_lea.sflag [#allocation4], %s287_s7 }
  0x72   : > { %p420_p6 = pnand %p427_p5, %p701_p11 }
  0x74   : > { %p421_p7 = pneg %p420_p6 }
  0x76   : > { %597 = dma.done.wait (%p421_p7), %s288_s4, 128  }
  0x77   : > { %599 = vsyncadd (%p421_p7), %s288_s4, 4294967168  ;;  %s298_s5 = scalar_lea.sflag [#allocation7], %s287_s7 }
  0x78   : > { %601 = dma.done.wait (%p421_p7), %s298_s5, 128  }
  0x79   : > { %603 = vsyncadd (%p421_p7), %s298_s5, 4294967168  ;;  %s22_s14 = sadd.s32 1, %s626_s14   ;;  %s791_s9 = smov %s610_s10 }
  0x7a   : > { %p19_p8 = scmp.ge.s32.totalorder %s22_s14, 5   ;;  %s792_s10 = smov %s614_s11 }
  0x7b   : > { %s793_s11 = smov %s699_s23  ;;  %s794_s12 = smov %s622_s13 }
  0x7c   : > { %s795_s13 = smov %s797_s17  ;;  %21 = sbr.rel (!%p19_p8) target bundleno = 8 (0x8), region = 86 }
  0x81   :  { %304 = vsyncpa [#allocation3], 1 }
  0x82   :  { %306 = vsyncpa [#allocation3 + $0x1], 1 }
  0x83   :  { %307 = vsyncpa [#allocation4], 1 }
  0x84   :  { %309 = vsyncpa [#allocation4 + $0x1], 1 }
  0x85   :  { %310 = vsyncpa [#allocation7], 1 }
  0x86   :  { %312 = vsyncpa [#allocation7 + $0x1], 1 }

</bundles_post_ra>
